<compile_context>
chip_gen: v7x
topology: tpu7x:2x2x1
jax: 0.10.0
libtpu: 0.0.40
codegen_flags: <defaults>
</compile_context>

<pallas_src>
import functools

import jax
import jax.numpy as jnp
import numpy as np
from jax import lax
from jax.experimental import pallas as pl
from jax.experimental.pallas import tpu as pltpu


def _proj_kernel(p_ref, w_ref, bce_ref, o_ref):
    """One grid step: project G (batch, channel) slabs of P patches each.

    p_ref:   (G, P, K)  bf16  im2col'd patches
    w_ref:   (K, D)     bf16  shared projection weight (constant index_map)
    bce_ref: (G, 1, D)  f32   per-slab bias + channel_embed row
    o_ref:   (G, P, D)  out   embedded tokens
    """
    def body(g, carry):
        acc = jnp.dot(p_ref[g], w_ref[...], preferred_element_type=jnp.float32)
        acc = acc + bce_ref[g]                  # exact fp32 bias/channel-embed add
        o_ref[g] = acc.astype(o_ref.dtype)      # lane-dense store (minor dim = D)
        return carry

    lax.fori_loop(0, p_ref.shape[0], body, None)


def _round_up(n, m):
    return (n + m - 1) // m * m


def _pick_group(bc, per_slab_bytes, budget_bytes):
    """Largest divisor G of bc whose double-buffered in+out blocks fit the budget,
    preferring an even number of grid steps >= 2 (v7x: 2 TCs share the single
    parallel grid axis), then >= 2 steps, then anything that fits (G=1 fallback)."""
    divisors = [g for g in range(1, bc + 1) if bc % g == 0]
    fits = [g for g in divisors if 2 * g * per_slab_bytes <= budget_bytes] or [1]
    even_steps = [g for g in fits if (bc // g) % 2 == 0]
    multi_steps = [g for g in fits if (bc // g) >= 2]
    pool = even_steps or multi_steps or fits
    return max(pool)


def patch_embed_per_channel(x, weight, bias, channel_embed, patch_size,
                            out_dtype=None):
    """Forward of PatchEmbedPerChannel.

    Args:
      x:             (B, Cin, H, W) float32 (NCHW, like PyTorch).
      weight:        (D, 1, 1, p, p) float32 -- PyTorch Conv3d weight layout.
      bias:          (D,) float32
      channel_embed: (1, D, Cin, 1, 1) float32
      patch_size:    int p
      out_dtype:     token dtype; defaults to x.dtype.  bf16 halves the dominant
                     HBM store stream if the consumer accepts bf16 tokens.
    Returns:
      (B, Cin * (H//p) * (W//p), D)
    """
    B, Cin, H, W = x.shape
    p = patch_size
    assert H % p == 0 and W % p == 0, "spatial dims must be divisible by patch size"
    Hp, Wp = H // p, W // p
    D = weight.shape[0]
    K = p * p
    P = Hp * Wp
    BC = B * Cin
    out_dtype = x.dtype if out_dtype is None else out_dtype

    cdt = jnp.bfloat16  # MXU-native compute dtype; accumulation stays fp32.

    # --- im2col operand expression (fused into the input DMA via allow_input_fusion,
    #     so it is not forced through HBM as a separate pass). -----------------------
    patches = (
        x.astype(cdt)
        .reshape(B, Cin, Hp, p, Wp, p)
        .transpose(0, 1, 2, 4, 3, 5)            # (b, c, ph, pw, i, j) = conv order
        .reshape(BC, P, K)
    )

    # Weight: Conv3d (D,1,1,p,p) -> (K, D) bf16 (K unpadded, full-extent block dim).
    w_mat = weight.reshape(D, K).T.astype(cdt)                       # (K, D)
    # bias + channel_embed as an exact fp32 per-slab row table, tiny (BC*D*4 bytes).
    ce = channel_embed.reshape(D, Cin).T                             # (Cin, D) fp32
    bce = jnp.tile(bias[None, :] + ce, (B, 1)).reshape(BC, 1, D)     # (BC, 1, D) fp32

    # --- block sizing: merge G slabs per grid step (VMEM-padded estimates). --------
    in_item = np.dtype(cdt).itemsize
    out_item = np.dtype(out_dtype).itemsize
    Kpad = _round_up(K, 128)
    Dpad = _round_up(D, 128)
    Ppad = _round_up(P, 8)
    per_slab = Ppad * Kpad * in_item + Ppad * Dpad * out_item + 8 * Dpad * 4
    w_bytes = _round_up(K, 8) * Dpad * in_item
    # ~30 MiB of double-buffered blocks + resident weight stays well under the
    # 44 MiB limit below (safe on v7x's 64 MiB/TC; v5e/v6e have 128 MiB).
    budget = max(30 * 1024 * 1024 - 2 * w_bytes, 0)
    G = _pick_group(BC, per_slab, budget)
    grid = (BC // G,)

    flops = 2 * BC * P * K * D
    bytes_accessed = (
        BC * P * K * in_item          # patches (bf16)
        + K * D * in_item             # weight
        + BC * D * 4                  # bias + channel_embed table
        + BC * P * D * out_item       # tokens out
    )

    out3d = pl.pallas_call(
        _proj_kernel,
        out_shape=jax.ShapeDtypeStruct((BC, P, D), out_dtype),
        grid_spec=pltpu.PrefetchScalarGridSpec(
            num_scalar_prefetch=0,
            grid=grid,
            in_specs=[
                pl.BlockSpec((G, P, K), lambda i: (i, 0, 0)),   # merged patch slabs
                pl.BlockSpec((K, D), lambda i: (0, 0)),         # resident weight
                pl.BlockSpec((G, 1, D), lambda i: (i, 0, 0)),   # bias + channel embed
            ],
            out_specs=pl.BlockSpec((G, P, D), lambda i: (i, 0, 0)),
        ),
        compiler_params=pltpu.CompilerParams(
            dimension_semantics=("parallel",),
            vmem_limit_bytes=44 * 1024 * 1024,
            # Let XLA fuse the im2col cast/transpose producer into the patches
            # operand instead of materializing it in HBM.
            allow_input_fusion=[True, False, False],
        ),
        cost_estimate=pl.CostEstimate(
            flops=flops, transcendentals=0, bytes_accessed=bytes_accessed
        ),
    )(patches, w_mat, bce)

    # Slab s = b*Cin + c, patch q = ph*Wp + pw  ->  token index c*P + q per batch,
    # matching PyTorch flatten(2).transpose(1,2).
    return out3d.reshape(B, Cin * P, D)


def _reference(x, weight, bias, channel_embed, patch_size):
    """Pure-JAX fp32 reference mirroring the PyTorch forward."""
    B, Cin, H, W = x.shape
    p = patch_size
    Hp, Wp = H // p, W // p
    D = weight.shape[0]
    patches = x.reshape(B, Cin, Hp, p, Wp, p).transpose(0, 1, 2, 4, 3, 5)
    patches = patches.reshape(B, Cin, Hp * Wp, p * p)
    w_mat = weight.reshape(D, p * p)
    out = jnp.einsum("bcpk,dk->bcpd", patches, w_mat) + bias
    ce = channel_embed.reshape(D, Cin).T                             # (Cin, D)
    out = out + ce[None, :, None, :]
    return out.reshape(B, Cin * Hp * Wp, D)


if __name__ == "__main__":
    # Small, module-consistent shapes. D=128 keeps the output lane-dense, matching
    # real embed dims (e.g. 768).
    B, Cin, img, p, D = 2, 4, 16, 4, 128

    key = jax.random.PRNGKey(0)
    kx, kw, kb, kc = jax.random.split(key, 4)

    x = jax.random.normal(kx, (B, Cin, img, img), dtype=jnp.float32)
    # Conv3d(1, D, kernel=(1,p,p)) weight shape: (D, 1, 1, p, p)
    weight = jax.random.normal(kw, (D, 1, 1, p, p), dtype=jnp.float32) * 0.05
    bias = jax.random.normal(kb, (D,), dtype=jnp.float32) * 0.01
    # channel_embed: (1, D, Cin, 1, 1), trunc_normal std=0.02 (plain normal here)
    channel_embed = jax.random.normal(kc, (1, D, Cin, 1, 1), dtype=jnp.float32) * 0.02

    y_ref = _reference(x, weight, bias, channel_embed, p)

    # Default path: tokens in x.dtype (fp32), exact fp32 bias/channel-embed add.
    run = jax.jit(functools.partial(patch_embed_per_channel, patch_size=p))
    y = jax.block_until_ready(run(x, weight, bias, channel_embed))
    assert y.shape == (B, Cin * (img // p) * (img // p), D), y.shape
    # bf16 activations/weights with fp32 accumulation vs fp32 reference.
    np.testing.assert_allclose(np.asarray(y), np.asarray(y_ref), rtol=2e-2, atol=2e-2)

    # bf16 token output path (halves the dominant HBM store stream; opt-in).
    run_bf16 = jax.jit(functools.partial(
        patch_embed_per_channel, patch_size=p, out_dtype=jnp.bfloat16))
    y16 = jax.block_until_ready(run_bf16(x, weight, bias, channel_embed))
    np.testing.assert_allclose(np.asarray(y16.astype(jnp.float32)),
                               np.asarray(y_ref), rtol=3e-2, atol=3e-2)

    print("KERNEL_OK")
</pallas_src>

<mosaic_0001>
module attributes {stable_mosaic.version = 11 : i64} {
  func.func @_proj_kernel(%arg0: i32, %arg1: memref<4x16x16xbf16, #tpu.memory_space<vmem>>, %arg2: memref<16x128xbf16, #tpu.memory_space<vmem>>, %arg3: memref<4x1x128xf32, #tpu.memory_space<vmem>>, %arg4: memref<4x16x128xf32, #tpu.memory_space<vmem>>) attributes {dimension_semantics = [#tpu.dimension_semantics<parallel>], iteration_bounds = array<i64: 2>, scalar_prefetch = 0 : i64, scratch_operands = 0 : i64, tpu.core_type = #tpu.core_type<tc>, window_params = [{transform_indices = @transform_0, window_bounds = array<i64: 4, 16, 16>}, {pipeline_mode = #tpu.pipeline_mode<synchronous>, transform_indices = @transform_1, window_bounds = array<i64: 16, 128>}, {transform_indices = @transform_2, window_bounds = array<i64: 4, 1, 128>}, {transform_indices = @transform_3, window_bounds = array<i64: 4, 16, 128>}]} {
    %c0_i32 = arith.constant 0 : i32
    %c4_i32 = arith.constant 4 : i32
    %0 = arith.addi %c0_i32, %c4_i32 : i32
    %c1_i32 = arith.constant 1 : i32
    scf.for %arg5 = %c0_i32 to %0 step %c1_i32  : i32 {
      %1 = arith.index_cast %arg5 : i32 to index
      %c0 = arith.constant 0 : index
      %c0_1 = arith.constant 0 : index
      %2 = vector.load %arg1[%1, %c0, %c0_1] : memref<4x16x16xbf16, #tpu.memory_space<vmem>>, vector<1x16x16xbf16>
      %3 = vector.shape_cast %2 : vector<1x16x16xbf16> to vector<16x16xbf16>
      %c0_2 = arith.constant 0 : index
      %c0_3 = arith.constant 0 : index
      %4 = vector.load %arg2[%c0_2, %c0_3] : memref<16x128xbf16, #tpu.memory_space<vmem>>, vector<16x128xbf16>
      %cst = arith.constant dense<0.000000e+00> : vector<16x128xf32>
      %5 = tpu.matmul %3, %4, %cst {dimension_numbers = #tpu.dot_dimension_numbers<[1], [0], [0], [1], [0, 0, 1, 1], [], []>} : vector<16x16xbf16>, vector<16x128xbf16>, vector<16x128xf32> -> vector<16x128xf32>
      %6 = arith.index_cast %arg5 : i32 to index
      %c0_4 = arith.constant 0 : index
      %c0_5 = arith.constant 0 : index
      %7 = vector.load %arg3[%6, %c0_4, %c0_5] : memref<4x1x128xf32, #tpu.memory_space<vmem>>, vector<1x1x128xf32>
      %8 = vector.shape_cast %7 : vector<1x1x128xf32> to vector<1x128xf32>
      %9 = vector.broadcast %8 : vector<1x128xf32> to vector<16x128xf32>
      %10 = arith.addf %5, %9 : vector<16x128xf32>
      %11 = arith.index_cast %arg5 : i32 to index
      %c0_6 = arith.constant 0 : index
      %c0_7 = arith.constant 0 : index
      %12 = vector.load %arg4[%11, %c0_6, %c0_7] : memref<4x16x128xf32, #tpu.memory_space<vmem>>, vector<1x16x128xf32>
      %13 = vector.shape_cast %12 : vector<1x16x128xf32> to vector<16x128xf32>
      %14 = vector.shape_cast %10 : vector<16x128xf32> to vector<1x16x128xf32>
      tpu.vector_store %arg4[%11, %c0_6, %c0_7], %14 {strides = array<i32>} : memref<4x16x128xf32, #tpu.memory_space<vmem>>, vector<1x16x128xf32>,
    }
    %c4_i32_0 = arith.constant 4 : i32
    return
  }
  func.func @transform_0(%arg0: i32) -> (i32, i32, i32) {
    %c0_i32 = arith.constant 0 : i32
    %c0_i32_0 = arith.constant 0 : i32
    %c0_i32_1 = arith.constant 0 : i32
    return %arg0, %c0_i32, %c0_i32_0 : i32, i32, i32
  }
  func.func @transform_1(%arg0: i32) -> (i32, i32) {
    %c0_i32 = arith.constant 0 : i32
    %c0_i32_0 = arith.constant 0 : i32
    %c0_i32_1 = arith.constant 0 : i32
    return %c0_i32, %c0_i32_0 : i32, i32
  }
  func.func @transform_2(%arg0: i32) -> (i32, i32, i32) {
    %c0_i32 = arith.constant 0 : i32
    %c0_i32_0 = arith.constant 0 : i32
    %c0_i32_1 = arith.constant 0 : i32
    return %arg0, %c0_i32, %c0_i32_0 : i32, i32, i32
  }
  func.func @transform_3(%arg0: i32) -> (i32, i32, i32) {
    %c0_i32 = arith.constant 0 : i32
    %c0_i32_0 = arith.constant 0 : i32
    %c0_i32_1 = arith.constant 0 : i32
    return %arg0, %c0_i32, %c0_i32_0 : i32, i32, i32
  }
}

</mosaic_0001>

<bundles_post_ra>
// kernel: patch_embed_per_channel.1
= control target key start
LH: loop header
LB: loop body
LE: loop exit
PB: predicated region body
PF: predicated region fallthrough
CT: control target
= control target key end

     0   :  { %8 = vsyncpa [#allocation3], 0  ;;  %s692_s0 = inlined_call_operand.vmem [shape: bf16[8,16,16], index: 0, kind: input, shape index: {}]   ;;  %s693_s1 = inlined_call_operand.vmem [shape: bf16[16,128], index: 1, kind: input, shape index: {}]   ;;  %s694_s2 = inlined_call_operand.vmem [shape: f32[8,1,128], index: 2, kind: input, shape index: {}]   ;;  %s695_s3 = inlined_call_operand.hbm [shape: f32[8,16,128], index: 3, kind: output, shape index: {}]  }
   0x1   :  { %10 = vsyncpa [#allocation3 + $0x1], 0  ;;  %s556_s12 = smov 0   ;;  %s558_s13 = smov 0  }
   0x2   :  { %s560_s14 = smov 0   ;;  %s562_s15 = smov 0  }
   0x3 LB: > { %s577_s16 = sadd.s32 4294967295, %s525_s15   ;;  %s372_s17 = sadd.s32 4294967294, %s525_s15   ;;  %s525_s15 = sphi %s562_s15, %s701_s15   ;;  %s521_s14 = sphi %s560_s14, %s700_s14   ;;  %s517_s13 = sphi %s558_s13, %s699_s13   ;;  %s513_s12 = sphi %s556_s12, %s698_s12  }
   0x4   : > { %s581_s18 = sadd.s32 1, %s525_s15   ;;  %s96_s19 = sadd.s32 1, %s521_s14 }
   0x5   : > { %s93_s20 = ssub.s32 %s525_s15, %s581_s18  ;;  %p106_p0 = scmp.ne.s32.totalorder %s521_s14, %s517_s13 }
   0x6   : > { %p94_p1 = scmp.eq.s32.totalorder %s93_s20, 0  ;;  %p107_p2 = scmp.eq.s32.totalorder %s577_s16, 1 }
   0x7   : > { %p112_p3 = scmp.ne.s32.totalorder %s517_s13, %s513_s12  ;;  %p113_p4 = scmp.eq.s32.totalorder %s372_s17, 1 }
   0x8   : > { %s592_s21 = scalar_select %p94_p1, %s521_s14, %s96_s19  }
   0x9   : > { %p594_p5 = por %p107_p2, %p106_p0  ;;  %p598_p6 = por %p113_p4, %p112_p3 }
   0xa   : > { %p375_p7 = scmp.ge.s32.totalorder %s525_s15, 1  ;;  %p152_p8 = scmp.lt.s32.totalorder %s525_s15, 3 }
   0xc   : > { %p153_p9 = pnand %p375_p7, %p152_p8 }
   0xd   : > { %s178_s24 = sand.u32 (!%p153_p9), 1, %s517_s13   ;;  %s377_s25 = sshll.u32 (!%p153_p9), %s577_s16, 2 }
   0xe   : > { %156 = sbr.rel (%p153_p9) target bundleno = 260 (0x104), region = 32  ;;  %s608_s26 = sshll.u32 (!%p153_p9), %s178_s24, 6 }
   0xf   : > { %p182_p10 = scmp.lt.s32.totalorder (!%p153_p9), %s377_s25, 7  ;;  %s180_s7 = scalar_lea.vmem (!%p153_p9), [#allocation2], %s608_s26 }
  0x10   : > { %s623_s8 = smov (!%p153_p9), 0  }
  0x15   : > { %s703_s25 = smov (!%p182_p10, %s377_s25), 7 }
  0x16   : > { %s394_s27 = sshll.u32 %s703_s25, 3  ;;  %s191_s30 = scalar_lea.vmem %s694_s2, %s703_s25 }
  0x17   : > { %s620_s6 = scalar_lea.vmem %s692_s0, %s394_s27 }
  0x18 LB: >> { %v457_v0 = vld [vmem:[%s693_s1] sm:$0xff]   ;;  %v531_v1 = vmov 0.0   ;;  %vm532_vm0 = vmmov 0   ;;  %s395_s11 = sshll.u32 %s529_s8, 3  ;;  %vm227_vm1 = vcmask 130048   ;;  %s208_s27 = scalar_lea.vmem %s191_s30, %s529_s8  ;;  %s529_s8 = sphi %s623_s8, %s200_s8  }
  0x19   : >> { %400 = vmatprep.subr.bf16.mxu0 %v531_v1  ;;  %402 = vmatprep.mubr.msk.bf16.mxu0 %vm532_vm0, %v531_v1  ;;  %s203_s17 = scalar_lea.vmem %s620_s6, %s395_s11  ;;  %s387_s28 = sshll.u32 %s529_s8, 4  ;;  %v383_v3 = vld [vmem:[%s208_s27] ss:$0 sm:$0xff] }
  0x1a   : >> { %401 = vmatpush3.bf16.msra.mxu0 %v457_v0  ;;  %v458_v2 = vld [vmem:[%s203_s17] sm:$0xff]   ;;  %s273_s29 = scalar_lea.vmem %s180_s7, %s387_s28 [#allocation2]  ;;  %s200_s8 = sadd.s32 1, %s529_s8  }
  0x1b   : >> { %p197_p11 = scmp.ge.s32.totalorder %s200_s8, 4  }
  0x1c   : > { %s397_s4 = sshll.u32 (%p197_p11), %s577_s16, 10  ;;  %s291_s11 = sshll.u32 (%p197_p11), %s180_s7, 4  ;;  %s647_s11 = int_to_ptr.vmem [resolvable:$true] %s291_s11 }
  0x1d   : >> { %403 = vmatmul.mubr.msk.bf16.vlgmr.msra.gmra.mrb[0].mxu0 %vm227_vm1, %v458_v2  ;;  %s643_s10 = scalar_lea.hbm (%p197_p11), %s695_s3, %s397_s4  ;;  %s651_s8 = scalar_lea.sflag (%p197_p11), [#allocation3], %s178_s24 }
  0x1e   : > { %s459_s25 = scalar_lea.vmem (%p197_p11), %s647_s11, 1024  ;;  %s533_s16 = smov (%p197_p11), [#allocation2]  }
  0x1f   : > { %p460_p12 = scmp.ne.s32.totalorder (%p197_p11), %s647_s11, %s459_s25  ;;  %s463_s30 = sshll.u32 (%p197_p11), %s533_s16, 4  ;;  %s464_s30 = int_to_ptr.vmem [resolvable:$false] %s463_s30 }
  0x20   : > { %s465_s6 = scalar_lea.vmem (%p197_p11), %s464_s30, 2048  ;;  %p466_p1 = scmp.lt.s32.totalorder (%p197_p11), %s647_s11, %s464_s30 }
  0x21   : > { %p461_p13 = pnand (%p197_p11), %p460_p12, %p594_p5  ;;  %p467_p2 = scmp.lt.s32.totalorder (%p197_p11), %s465_s6, %s459_s25 }
  0x23   : > { %p462_p0 = pneg (%p197_p11), %p461_p13  ;;  %p468_p3 = por (%p197_p11), %p467_p2, %p466_p1 }
  0x25   : > { %p469_p4 = pnand (%p197_p11), %p468_p3, %p462_p0 }
  0xef   : > { %199 = sbr.rel (!%p197_p11) target bundleno = 24 (0x18), region = 80 }
  0xf0   : >> { %v265_v4 = vpop.f32.mrb[0].mxu0 }
  0xf1   : >> { %v266_v5 = vadd.f32 %v383_v3, %v265_v4  ;;  %v404_v6 = vpop.f32.mrb[1].mxu0 }
  0xf2   : >> { %v268_v7 = vpop.f32.mrb[2].mxu0 }
  0xf3   : >> { %274 = vst [vmem:[%s273_s29] sm:$0xff] %v266_v5  ;;  %v269_v8 = vadd.f32 %v383_v3, %v268_v7  ;;  %v405_v9 = vpop.f32.mrb[3].mxu0 }
  0xf5   : >> { %275 = vst [vmem:[%s273_s29 + $0x8] sm:$0xff] %v269_v8 }
  0xf6   : > { %472 = shalt.err (!%p469_p4)
}
  0xf7   : > { %s473_s24 = scalar_lea.hbm %s643_s10, 1024  ;;  %s477_s17 = scalar_lea.hbm %s695_s3, 2048 }
  0xf8   : > { %p474_p7 = scmp.ne.s32.totalorder %s643_s10, %s473_s24  ;;  %p478_p10 = scmp.lt.u32.totalorder %s643_s10, %s695_s3 }
  0xf9   : > { %p479_p11 = scmp.lt.u32.totalorder %s477_s17, %s473_s24  ;;  %p481_p13 = scmp.lt.u32.totalorder %s473_s24, %s643_s10 }
  0xfa   : > { %p475_p8 = pnand %p474_p7, %p594_p5 }
  0xfb   : > { %p480_p12 = por %p479_p11, %p478_p10 }
  0xfc   : > { %p476_p9 = pneg %p475_p8 }
  0xfd   : > { %p482_p0 = por %p481_p13, %p480_p12 }
  0xff   : > { %p483_p1 = pnand %p482_p0, %p476_p9 }
 0x101   : > { %486 = shalt.err (!%p483_p1)
}
 0x102   : > { %s534_s27 = smov 128   ;;  %s535_s28 = smov 8  }
 0x103   : > { %406 = dma.vmem_to_hbm [thread:$0]  (%p594_p5), %s647_s11, 1024, %s643_s10, %s651_s8, %s534_s27, %s534_s27, %s535_s28  }
 0x104 PF: > { %p412_p2 = scmp.ge.s32.totalorder %s525_s15, 2  ;;  %s306_s29 = sand.u32 1, %s513_s12  }
 0x105   : > { %s307_s4 = scalar_lea.sflag [#allocation3], %s306_s29 }
 0x106   : > { %p409_p3 = pnand %p412_p2, %p598_p6 }
 0x108   : > { %508 = dma.done.wait (!%p409_p3), %s307_s4, 1024  }
 0x109   : > { %510 = vsyncadd (!%p409_p3), %s307_s4, 4294966272  ;;  %p13_p4 = scmp.ge.s32.totalorder %s581_s18, 4   ;;  %s698_s12 = smov %s517_s13 }
 0x10a   : > { %s699_s13 = smov %s521_s14  ;;  %s700_s14 = smov %s592_s21 }
 0x10b   : > { %s701_s15 = smov %s581_s18  ;;  %15 = sbr.rel (!%p13_p4) target bundleno = 3 (0x3), region = 91 }
 0x112   :  { %312 = vsyncpa [#allocation3], 1 }
 0x113   :  { %314 = vsyncpa [#allocation3 + $0x1], 1 }

</bundles_post_ra>
